<compile_context>
chip_gen: v7x
topology: tpu7x:2x2x1
jax: 0.10.0
libtpu: 0.0.40
codegen_flags: <defaults>
</compile_context>

<pallas_src>
import jax
import jax.numpy as jnp
from jax.experimental import pallas as pl
import numpy as np

# ---- small synthetic sizes (stand-ins for the real ResNet/Linear dims) ----
B = 2                      # batch
C_IN = 3                   # image channels
IMG = 28                   # image spatial size
PATCH = 4                  # stand-in "conv" stride / kernel
GRID_HW = IMG // PATCH     # 7  -> 7x7 feature map, like ResNet-152 @ 224
N_POS = GRID_HW * GRID_HW  # 49 spatial positions
KP = C_IN * PATCH * PATCH  # 48 patch vector length
C_FEAT = 128               # stand-in for 2048 ResNet channels
HIDDEN = 32                # hidden_size (affine_a output)
EMBED = 32                 # embed_size  (affine_b output)

# ---- padded / fused layout constants ----
ROWS_PER_B = 64            # 49 spatial rows + 1 mean row, padded to bf16 sublane pack (16)
KP_PAD = 128               # 48 -> 128 so the bf16 minor dim fills a full lane tile
OUT_PAD = 128              # HIDDEN(32) || EMBED(32) || zeros -> lane-dense 128-wide output
ROWS = B * ROWS_PER_B      # 128 total rows in the flattened slab


def attentive_cnn_kernel(x_ref, w_ref, b_ref, out_ref):
    """Single fused stage: [ROWS,128] bf16 @ [128,128] bf16 (f32 acc) + bias, relu."""
    y = jnp.dot(x_ref[...], w_ref[...], preferred_element_type=jnp.float32)
    out_ref[...] = jnp.maximum(y + b_ref[...], 0.0)     # relu, f32, lane-dense store


def prepare_params(wp, wa, ba, wb, bb):
    """One-time parameter prep (hoisted out of the per-call forward path).

    Folds the linear backbone stand-in into affine_a / affine_b in f32, pads to a
    128x128 bf16 tile, and builds the fused 128-lane bias row.
    """
    wab = jnp.concatenate([wa, wb], axis=1)                       # [C_FEAT, 64]
    w_fused = wp.astype(jnp.float32) @ wab.astype(jnp.float32)    # [KP, 64], f32 fold
    w_fused = jnp.pad(w_fused, ((0, KP_PAD - KP),
                                (0, OUT_PAD - (HIDDEN + EMBED))))
    w_fused = w_fused.astype(jnp.bfloat16)                        # [128, 128] bf16, cast once
    bias = jnp.pad(jnp.concatenate([ba, bb], axis=1),
                   ((0, 0), (0, OUT_PAD - (HIDDEN + EMBED)))).astype(jnp.float32)  # [1, 128]
    return w_fused, bias


@jax.jit
def attentive_cnn(images, w_fused, bias):
    """images: [B, C_IN, IMG, IMG] (NCHW f32). Returns (V [B,49,HIDDEN], v_g [B,EMBED])."""
    # im2col glue (fused under jit): non-overlapping PATCHxPATCH patches -> [B, 49, KP].
    x = images.reshape(B, C_IN, GRID_HW, PATCH, GRID_HW, PATCH)
    x = jnp.transpose(x, (0, 2, 4, 1, 3, 5))                      # [B, 7, 7, C_IN, P, P]
    patches = x.reshape(B, N_POS, KP).astype(jnp.float32)

    # Avgpool hoisted via linearity: row N_POS carries mean(patches) so that
    # mean(patches) @ W_fused == mean(backbone features) @ [wa||wb] (v_g path).
    mean_row = jnp.mean(patches, axis=1, keepdims=True)           # [B, 1, KP]
    slab = jnp.concatenate([patches, mean_row], axis=1)           # [B, 50, KP]
    slab = jnp.pad(slab, ((0, 0), (0, ROWS_PER_B - (N_POS + 1)), (0, KP_PAD - KP)))
    slab2d = slab.reshape(ROWS, KP_PAD).astype(jnp.bfloat16)      # [128, 128] bf16

    flops = 2 * ROWS * KP_PAD * OUT_PAD
    bytes_accessed = (slab2d.size * 2 + w_fused.size * 2
                      + bias.size * 4 + ROWS * OUT_PAD * 4)

    # Single grid step: total work is far below per-step overhead on every generation.
    out2d = pl.pallas_call(
        attentive_cnn_kernel,
        out_shape=jax.ShapeDtypeStruct((ROWS, OUT_PAD), jnp.float32),
        grid=(1,),
        in_specs=[
            pl.BlockSpec((ROWS, KP_PAD), lambda i: (0, 0)),       # fused patch slab
            pl.BlockSpec((KP_PAD, OUT_PAD), lambda i: (0, 0)),    # W_fused (resident)
            pl.BlockSpec((1, OUT_PAD), lambda i: (0, 0)),         # ba||bb (resident)
        ],
        out_specs=pl.BlockSpec((ROWS, OUT_PAD), lambda i: (0, 0)),
        cost_estimate=pl.CostEstimate(flops=flops, transcendentals=0,
                                      bytes_accessed=bytes_accessed),
    )(slab2d, w_fused, bias)

    # Un-pad / split the fused lane-dense slab (fused under the same jit).
    out3 = out2d.reshape(B, ROWS_PER_B, OUT_PAD)
    V = out3[:, :N_POS, :HIDDEN]                                  # [B, 49, HIDDEN]
    v_g = out3[:, N_POS, HIDDEN:HIDDEN + EMBED]                   # [B, EMBED]
    return V, v_g


def _reference(images, wp, wa, ba, wb, bb):
    """Pure-JAX f32 reference of the same forward (unfused, two-stage)."""
    x = images.reshape(B, C_IN, GRID_HW, PATCH, GRID_HW, PATCH)
    x = jnp.transpose(x, (0, 2, 4, 1, 3, 5)).reshape(B, N_POS, KP)
    A = jnp.einsum('bnk,kc->bnc', x, wp)
    a_g = jnp.mean(A, axis=1)
    V = jax.nn.relu(jnp.einsum('bnc,ch->bnh', A, wa) + ba)
    v_g = jax.nn.relu(a_g @ wb + bb)
    return V, v_g


def _kaiming_uniform(key, fan_in, shape):
    bound = np.sqrt(6.0 / fan_in)
    return jax.random.uniform(key, shape, jnp.float32, minval=-bound, maxval=bound)


if __name__ == "__main__":
    key = jax.random.PRNGKey(0)
    k_img, k_wp, k_wa, k_wb = jax.random.split(key, 4)

    images = jax.random.normal(k_img, (B, C_IN, IMG, IMG), jnp.float32)

    # Deterministic parameter init (weights stored pre-transposed: [in, out]).
    wp = _kaiming_uniform(k_wp, KP, (KP, C_FEAT))            # backbone stand-in
    wa = _kaiming_uniform(k_wa, C_FEAT, (C_FEAT, HIDDEN))    # affine_a.weight (kaiming, fan_in)
    ba = jnp.zeros((1, HIDDEN), jnp.float32)                 # affine_a.bias = 0
    wb = _kaiming_uniform(k_wb, C_FEAT, (C_FEAT, EMBED))     # affine_b.weight
    bb = jnp.zeros((1, EMBED), jnp.float32)                  # affine_b.bias = 0

    # One-time fused / padded parameter prep (outside the per-forward path).
    w_fused, bias = prepare_params(wp, wa, ba, wb, bb)
    w_fused, bias = jax.block_until_ready((w_fused, bias))

    V, v_g = attentive_cnn(images, w_fused, bias)
    jax.block_until_ready((V, v_g))

    V_ref, vg_ref = _reference(images, wp, wa, ba, wb, bb)
    # bf16 matmul operands / folded weight (f32 accumulation) -> loosened tolerances.
    np.testing.assert_allclose(np.asarray(V), np.asarray(V_ref), rtol=2e-2, atol=5e-2)
    np.testing.assert_allclose(np.asarray(v_g), np.asarray(vg_ref), rtol=2e-2, atol=5e-2)

    assert V.shape == (B, N_POS, HIDDEN) and v_g.shape == (B, EMBED)
    print("KERNEL_OK")
</pallas_src>

<mosaic_0001>
module attributes {stable_mosaic.version = 11 : i64} {
  func.func @attentive_cnn_kernel(%arg0: i32, %arg1: memref<128x128xbf16, #tpu.memory_space<vmem>>, %arg2: memref<128x128xbf16, #tpu.memory_space<vmem>>, %arg3: memref<1x128xf32, #tpu.memory_space<vmem>>, %arg4: memref<128x128xf32, #tpu.memory_space<vmem>>) attributes {dimension_semantics = [#tpu.dimension_semantics<arbitrary>], iteration_bounds = array<i64: 1>, scalar_prefetch = 0 : i64, scratch_operands = 0 : i64, tpu.core_type = #tpu.core_type<tc>, window_params = [{pipeline_mode = #tpu.pipeline_mode<synchronous>, transform_indices = @transform_0, window_bounds = array<i64: 128, 128>}, {pipeline_mode = #tpu.pipeline_mode<synchronous>, transform_indices = @transform_1, window_bounds = array<i64: 128, 128>}, {pipeline_mode = #tpu.pipeline_mode<synchronous>, transform_indices = @transform_2, window_bounds = array<i64: 1, 128>}, {pipeline_mode = #tpu.pipeline_mode<synchronous>, transform_indices = @transform_3, window_bounds = array<i64: 128, 128>}]} {
    %c0 = arith.constant 0 : index
    %c0_0 = arith.constant 0 : index
    %0 = vector.load %arg1[%c0, %c0_0] : memref<128x128xbf16, #tpu.memory_space<vmem>>, vector<128x128xbf16>
    %c0_1 = arith.constant 0 : index
    %c0_2 = arith.constant 0 : index
    %1 = vector.load %arg2[%c0_1, %c0_2] : memref<128x128xbf16, #tpu.memory_space<vmem>>, vector<128x128xbf16>
    %cst = arith.constant dense<0.000000e+00> : vector<128x128xf32>
    %2 = tpu.matmul %0, %1, %cst {dimension_numbers = #tpu.dot_dimension_numbers<[1], [0], [0], [1], [0, 0, 1, 1], [], []>} : vector<128x128xbf16>, vector<128x128xbf16>, vector<128x128xf32> -> vector<128x128xf32>
    %c0_3 = arith.constant 0 : index
    %c0_4 = arith.constant 0 : index
    %3 = vector.load %arg3[%c0_3, %c0_4] : memref<1x128xf32, #tpu.memory_space<vmem>>, vector<1x128xf32>
    %4 = vector.broadcast %3 : vector<1x128xf32> to vector<128x128xf32>
    %5 = arith.addf %2, %4 : vector<128x128xf32>
    %cst_5 = arith.constant 0.000000e+00 : f32
    %6 = vector.broadcast %cst_5 : f32 to vector<128x128xf32>
    %7 = arith.maximumf %5, %6 : vector<128x128xf32>
    %c0_6 = arith.constant 0 : index
    %c0_7 = arith.constant 0 : index
    %8 = vector.load %arg4[%c0_6, %c0_7] : memref<128x128xf32, #tpu.memory_space<vmem>>, vector<128x128xf32>
    tpu.vector_store %arg4[%c0_6, %c0_7], %7 {strides = array<i32>} : memref<128x128xf32, #tpu.memory_space<vmem>>, vector<128x128xf32>,
    return
  }
  func.func @transform_0(%arg0: i32) -> (i32, i32) {
    %c0_i32 = arith.constant 0 : i32
    %c0_i32_0 = arith.constant 0 : i32
    %c0_i32_1 = arith.constant 0 : i32
    return %c0_i32, %c0_i32_0 : i32, i32
  }
  func.func @transform_1(%arg0: i32) -> (i32, i32) {
    %c0_i32 = arith.constant 0 : i32
    %c0_i32_0 = arith.constant 0 : i32
    %c0_i32_1 = arith.constant 0 : i32
    return %c0_i32, %c0_i32_0 : i32, i32
  }
  func.func @transform_2(%arg0: i32) -> (i32, i32) {
    %c0_i32 = arith.constant 0 : i32
    %c0_i32_0 = arith.constant 0 : i32
    %c0_i32_1 = arith.constant 0 : i32
    return %c0_i32, %c0_i32_0 : i32, i32
  }
  func.func @transform_3(%arg0: i32) -> (i32, i32) {
    %c0_i32 = arith.constant 0 : i32
    %c0_i32_0 = arith.constant 0 : i32
    %c0_i32_1 = arith.constant 0 : i32
    return %c0_i32, %c0_i32_0 : i32, i32
  }
}

</mosaic_0001>

<bundles_post_ra>
// kernel: attentive_cnn.1
= control target key start
LH: loop header
LB: loop body
LE: loop exit
PB: predicated region body
PF: predicated region fallthrough
CT: control target
= control target key end

     0   :  { %s499_s1 = inlined_call_operand.vmem [shape: bf16[128,128], index: 1, kind: input, shape index: {}]   ;;  %s500_s0 = inlined_call_operand.vmem [shape: bf16[128,128], index: 0, kind: input, shape index: {}]   ;;  %s501_s2 = inlined_call_operand.vmem [shape: f32[1,128], index: 2, kind: input, shape index: {}]   ;;  %s502_s3 = inlined_call_operand.vmem [shape: f32[128,128], index: 3, kind: output, shape index: {}]  }
   0x1   :  { %v364_v0 = vld [vmem:[%s499_s1] sm:$0xff]   ;;  %v365_v1 = vld [vmem:[%s499_s1 + $0x8] sm:$0xff]   ;;  %v366_v2 = vld [vmem:[%s499_s1 + $0x10] sm:$0xff]  }
   0x2   :  { %316 = vmatprep.subr.bf16.mxu0 %v364_v0  ;;  %348 = vmatprep.subr.bf16.mxu1 %v364_v0  ;;  %v367_v3 = vld [vmem:[%s499_s1 + $0x18] sm:$0xff]   ;;  %v372_v4 = vld [vmem:[%s500_s0] sm:$0xff]   ;;  %v369_v7 = vld [vmem:[%s499_s1 + $0x28] sm:$0xff]  }
   0x3   :  { %317 = vmatpush3.bf16.msra.mxu0 %v364_v0  ;;  %356 = vmatpush3.bf16.msra.mxu1 %v364_v0  ;;  %v373_v5 = vld [vmem:[%s500_s0 + $0x20] sm:$0xff]   ;;  %v370_v8 = vld [vmem:[%s499_s1 + $0x30] sm:$0xff]   ;;  %v371_v9 = vld [vmem:[%s499_s1 + $0x38] sm:$0xff]  }
   0x4   :  { %318 = vmatprep.subr.bf16.mxu0 %v365_v1  ;;  %349 = vmatprep.subr.bf16.mxu1 %v365_v1  ;;  %v368_v6 = vld [vmem:[%s499_s1 + $0x20] sm:$0xff]   ;;  %v374_v10 = vld [vmem:[%s500_s0 + $0x8] sm:$0xff]   ;;  %v376_v12 = vld [vmem:[%s500_s0 + $0x10] sm:$0xff]  }
   0x5   :  { %332 = vmatprep.mubr.bf16.mxu0 %v372_v4  ;;  %340 = vmatprep.mubr.bf16.mxu1 %v373_v5  ;;  %v375_v11 = vld [vmem:[%s500_s0 + $0x28] sm:$0xff]   ;;  %v377_v13 = vld [vmem:[%s500_s0 + $0x30] sm:$0xff]   ;;  %v378_v14 = vld [vmem:[%s500_s0 + $0x18] sm:$0xff]  }
   0x6   :  { %v379_v15 = vld [vmem:[%s500_s0 + $0x38] sm:$0xff]   ;;  %v283_v16 = vld [vmem:[%s501_s2] ss:$0 sm:$0xff] }
   0x7   :  { %319 = vmatpush3.bf16.msra.mxu0 %v365_v1  ;;  %357 = vmatpush3.bf16.msra.mxu1 %v365_v1 }
   0x8   :  { %320 = vmatprep.subr.bf16.mxu0 %v366_v2  ;;  %350 = vmatprep.subr.bf16.mxu1 %v366_v2 }
   0xb   :  { %321 = vmatpush3.bf16.msra.mxu0 %v366_v2  ;;  %358 = vmatpush3.bf16.msra.mxu1 %v366_v2 }
   0xc   :  { %322 = vmatprep.subr.bf16.mxu0 %v367_v3  ;;  %351 = vmatprep.subr.bf16.mxu1 %v367_v3 }
   0xf   :  { %323 = vmatpush3.bf16.msra.mxu0 %v367_v3  ;;  %359 = vmatpush3.bf16.msra.mxu1 %v367_v3 }
  0x10   :  { %324 = vmatprep.subr.bf16.mxu0 %v368_v6  ;;  %352 = vmatprep.subr.bf16.mxu1 %v368_v6 }
  0x13   :  { %325 = vmatpush3.bf16.msra.mxu0 %v368_v6  ;;  %360 = vmatpush3.bf16.msra.mxu1 %v368_v6 }
  0x14   :  { %326 = vmatprep.subr.bf16.mxu0 %v369_v7  ;;  %353 = vmatprep.subr.bf16.mxu1 %v369_v7 }
  0x17   :  { %327 = vmatpush3.bf16.msra.mxu0 %v369_v7  ;;  %361 = vmatpush3.bf16.msra.mxu1 %v369_v7 }
  0x18   :  { %328 = vmatprep.subr.bf16.mxu0 %v370_v8  ;;  %354 = vmatprep.subr.bf16.mxu1 %v370_v8 }
  0x1b   :  { %329 = vmatpush3.bf16.msra.mxu0 %v370_v8  ;;  %362 = vmatpush3.bf16.msra.mxu1 %v370_v8 }
  0x1c   :  { %330 = vmatprep.subr.bf16.mxu0 %v371_v9  ;;  %355 = vmatprep.subr.bf16.mxu1 %v371_v9 }
  0x1f   :  { %331 = vmatpush3.bf16.msra.mxu0 %v371_v9  ;;  %363 = vmatpush3.bf16.msra.mxu1 %v371_v9 }
  0x22   :  { %333 = vmatmul.mubr.bf16.vlgmr.msra.gmra.mrb[0].mxu0 %v374_v10  ;;  %341 = vmatmul.mubr.bf16.vlgmr.msra.gmra.mrb[0].mxu1 %v375_v11 }
  0x23   :  { %336 = vmatprep.mubr.bf16.mxu0 %v376_v12  ;;  %344 = vmatprep.mubr.bf16.mxu1 %v377_v13 }
  0x2a   :  { %337 = vmatmul.mubr.bf16.gmra.mrb[4].mxu0 %v378_v14  ;;  %345 = vmatmul.mubr.bf16.gmra.mrb[4].mxu1 %v379_v15 }
  0xf5   :  { %v334_v17 = vpop.f32.mrb[0].mxu0  ;;  %v342_v18 = vpop.f32.mrb[0].mxu1 }
  0xf6   :  { %v193_v19 = vadd.f32 %v334_v17, %v283_v16  ;;  %v225_v20 = vadd.f32 %v342_v18, %v283_v16  ;;  %v184_v21 = vpop.f32.mrb[1].mxu0  ;;  %v216_v22 = vpop.f32.mrb[1].mxu1 }
  0xf7   :  { %v185_v23 = vadd.f32 %v283_v16, %v184_v21  ;;  %v217_v24 = vadd.f32 %v283_v16, %v216_v22  ;;  %v335_v25 = vpop.f32.mrb[2].mxu0  ;;  %v343_v26 = vpop.f32.mrb[2].mxu1 }
  0xf8   :  { %v249_v27 = vmax.f32 %v193_v19, 0.0  ;;  %v257_v28 = vmax.f32 %v225_v20, 0.0  ;;  %v196_v29 = vadd.f32 %v335_v25, %v283_v16  ;;  %v228_v30 = vadd.f32 %v343_v26, %v283_v16  ;;  %v187_v31 = vpop.f32.mrb[3].mxu0  ;;  %v219_v32 = vpop.f32.mrb[3].mxu1 }
  0xf9   :  { %v247_v33 = vmax.f32 %v185_v23, 0.0  ;;  %v255_v34 = vmax.f32 %v217_v24, 0.0  ;;  %v188_v35 = vadd.f32 %v283_v16, %v187_v31  ;;  %v220_v36 = vadd.f32 %v283_v16, %v219_v32 }
  0xfa   :  { %265 = vst [vmem:[%s502_s3 + $0x10] sm:$0xff] %v249_v27  ;;  %273 = vst [vmem:[%s502_s3 + $0x50] sm:$0xff] %v257_v28  ;;  %v250_v37 = vmax.f32 %v196_v29, 0.0  ;;  %v258_v38 = vmax.f32 %v228_v30, 0.0 }
  0xfb   :  { %263 = vst [vmem:[%s502_s3] sm:$0xff] %v247_v33  ;;  %271 = vst [vmem:[%s502_s3 + $0x40] sm:$0xff] %v255_v34  ;;  %v248_v39 = vmax.f32 %v188_v35, 0.0  ;;  %v256_v40 = vmax.f32 %v220_v36, 0.0 }
  0xfc   :  { %266 = vst [vmem:[%s502_s3 + $0x18] sm:$0xff] %v250_v37  ;;  %274 = vst [vmem:[%s502_s3 + $0x58] sm:$0xff] %v258_v38 }
  0xfd   :  { %264 = vst [vmem:[%s502_s3 + $0x8] sm:$0xff] %v248_v39  ;;  %272 = vst [vmem:[%s502_s3 + $0x48] sm:$0xff] %v256_v40  ;;  %v338_v41 = vpop.f32.mrb[4].mxu0  ;;  %v346_v42 = vpop.f32.mrb[4].mxu1 }
  0xfe   :  { %v209_v43 = vadd.f32 %v338_v41, %v283_v16  ;;  %v241_v44 = vadd.f32 %v346_v42, %v283_v16  ;;  %v200_v45 = vpop.f32.mrb[5].mxu0  ;;  %v232_v46 = vpop.f32.mrb[5].mxu1 }
  0xff   :  { %v201_v47 = vadd.f32 %v283_v16, %v200_v45  ;;  %v233_v48 = vadd.f32 %v283_v16, %v232_v46  ;;  %v339_v49 = vpop.f32.mrb[6].mxu0  ;;  %v347_v50 = vpop.f32.mrb[6].mxu1 }
 0x100   :  { %v253_v51 = vmax.f32 %v209_v43, 0.0  ;;  %v261_v52 = vmax.f32 %v241_v44, 0.0  ;;  %v212_v53 = vadd.f32 %v339_v49, %v283_v16  ;;  %v244_v54 = vadd.f32 %v347_v50, %v283_v16  ;;  %v203_v55 = vpop.f32.mrb[7].mxu0  ;;  %v235_v56 = vpop.f32.mrb[7].mxu1 }
 0x101   :  { %v251_v57 = vmax.f32 %v201_v47, 0.0  ;;  %v259_v58 = vmax.f32 %v233_v48, 0.0  ;;  %v204_v59 = vadd.f32 %v283_v16, %v203_v55  ;;  %v236_v60 = vadd.f32 %v283_v16, %v235_v56 }
 0x102   :  { %269 = vst [vmem:[%s502_s3 + $0x30] sm:$0xff] %v253_v51  ;;  %277 = vst [vmem:[%s502_s3 + $0x70] sm:$0xff] %v261_v52  ;;  %v254_v61 = vmax.f32 %v212_v53, 0.0  ;;  %v262_v62 = vmax.f32 %v244_v54, 0.0 }
 0x103   :  { %267 = vst [vmem:[%s502_s3 + $0x20] sm:$0xff] %v251_v57  ;;  %275 = vst [vmem:[%s502_s3 + $0x60] sm:$0xff] %v259_v58  ;;  %v252_v63 = vmax.f32 %v204_v59, 0.0  ;;  %v260_v0 = vmax.f32 %v236_v60, 0.0 }
 0x104   :  { %270 = vst [vmem:[%s502_s3 + $0x38] sm:$0xff] %v254_v61  ;;  %278 = vst [vmem:[%s502_s3 + $0x78] sm:$0xff] %v262_v62 }
 0x105   :  { %268 = vst [vmem:[%s502_s3 + $0x28] sm:$0xff] %v252_v63  ;;  %276 = vst [vmem:[%s502_s3 + $0x68] sm:$0xff] %v260_v0 }

</bundles_post_ra>
